<compile_context>
chip_gen: v7x
topology: tpu7x:2x2x1
jax: 0.10.0
libtpu: 0.0.40
codegen_flags: <defaults>
</compile_context>

<pallas_src>
import math

import jax
import jax.numpy as jnp
from jax.experimental import pallas as pl
from jax.experimental.pallas import tpu as pltpu

LANE = 128


def _round_up(n, m):
    return (n + m - 1) // m * m


# ----------------------------- Pallas kernel --------------------------------
def _mlp_kernel(x_ref, w1_ref, b1_ref, w2_ref, b2_ref, wo_ref, bo_ref, o_ref):
    # layer-0: fc (f32 MXU accumulate) + bias + relu
    h = jnp.dot(x_ref[...], w1_ref[...], preferred_element_type=jnp.float32)
    h = jnp.maximum(h + b1_ref[...], 0.0)
    # layer-1: fc + bias + relu
    h = jnp.dot(h, w2_ref[...], preferred_element_type=jnp.float32)
    h = jnp.maximum(h + b2_ref[...], 0.0)
    # output head: plain linear, narrow N == real out_dim (no lane padding
    # is streamed back to HBM)
    o = jnp.dot(h, wo_ref[...], preferred_element_type=jnp.float32)
    o_ref[...] = (o + bo_ref[...]).astype(o_ref.dtype)


# ------------------------------- wrapper -------------------------------------
def network_forward(x, params):
    """Runs Network.forward; returns a list of output tensors (one head)."""
    w1, b1 = params["w1"], params["b1"]
    w2, b2 = params["w2"], params["b2"]
    wo, bo = params["wo"], params["bo"]

    x = x.astype(jnp.float32)
    B, d_in = x.shape
    h1_p = w1.shape[1]
    h2_p = w2.shape[1]
    out_dim = wo.shape[1]

    # --- batch-tile selection --------------------------------------------------
    if B <= 1024:
        # Small / mid batch: one grid step, no pipeline machinery to amortize.
        TM = _round_up(max(B, 8), 8)
    else:
        # Large batch: big tiles (amortize ~0.35 us/step overhead) but keep at
        # least ~4 grid steps so the "parallel" axis can be split across
        # v7x's two TensorCores.
        TM = min(2048, _round_up(-(-B // 4), 8))

    grid = (pl.cdiv(B, TM),)  # ragged last block handled by Pallas (no batch pad)

    const2 = lambda i: (0, 0)  # weights/biases: same block every step -> DMA'd once

    flops = 2 * B * (d_in * h1_p + h1_p * h2_p + h2_p * out_dim)
    bytes_accessed = 4 * (x.size + w1.size + b1.size + w2.size + b2.size
                          + wo.size + bo.size + B * out_dim)

    out = pl.pallas_call(
        _mlp_kernel,
        out_shape=jax.ShapeDtypeStruct((B, out_dim), jnp.float32),
        grid=grid,
        in_specs=[
            pl.BlockSpec((TM, d_in), lambda i: (i, 0)),   # streamed x tiles (native width)
            pl.BlockSpec((d_in, h1_p), const2),           # resident weights / biases
            pl.BlockSpec((1, h1_p), const2),
            pl.BlockSpec((h1_p, h2_p), const2),
            pl.BlockSpec((1, h2_p), const2),
            pl.BlockSpec((h2_p, out_dim), const2),
            pl.BlockSpec((1, out_dim), const2),
        ],
        out_specs=pl.BlockSpec((TM, out_dim), lambda i: (i, 0)),
        compiler_params=pltpu.CompilerParams(
            dimension_semantics=("parallel",),     # shard batch across TCs (v7x)
            vmem_limit_bytes=32 * 1024 * 1024,     # generous; footprint is <10 MiB
        ),
        cost_estimate=pl.CostEstimate(
            flops=flops, transcendentals=0, bytes_accessed=bytes_accessed),
    )(x, w1, b1, w2, b2, wo, bo)

    return [out]  # Network.forward returns a list (one per output head)


# -------------------------- deterministic init ------------------------------
def _xavier_uniform(key, fan_in, fan_out, gain=1.0):
    a = gain * math.sqrt(6.0 / (fan_in + fan_out))
    # stored already transposed: (in, out)
    return jax.random.uniform(key, (fan_in, fan_out), jnp.float32, -a, a)


def _pad2(a, rows, cols, dtype):
    out = jnp.zeros((rows, cols), dtype)
    return out.at[: a.shape[0], : a.shape[1]].set(a.astype(dtype))


def init_network_params(key, inputs, hidden1, hidden2, outputs):
    ks = jax.random.split(key, 6)
    relu_gain = math.sqrt(2.0)  # nn.init.calculate_gain('relu')

    # Only the HIDDEN dims are lane-padded (weights are VMEM-resident, so this
    # costs nothing on the HBM streams); input and output dims stay native.
    h1_p = _round_up(hidden1, LANE)
    h2_p = _round_up(hidden2, LANE)

    w1 = _xavier_uniform(ks[0], inputs, hidden1, relu_gain)
    b1 = 0.1 * jax.random.normal(ks[1], (1, hidden1), jnp.float32)
    w2 = _xavier_uniform(ks[2], hidden1, hidden2, relu_gain)
    b2 = 0.1 * jax.random.normal(ks[3], (1, hidden2), jnp.float32)
    wo = _xavier_uniform(ks[4], hidden2, outputs, 1.0)
    bo = 0.1 * jax.random.normal(ks[5], (1, outputs), jnp.float32)

    # Zero-padded hidden rows/cols contribute exactly 0 through bias+ReLU, so
    # padding is numerically inert.
    return {
        "w1": _pad2(w1, inputs, h1_p, jnp.float32),
        "b1": _pad2(b1, 1, h1_p, jnp.float32),
        "w2": _pad2(w2, h1_p, h2_p, jnp.float32),
        "b2": _pad2(b2, 1, h2_p, jnp.float32),
        "wo": _pad2(wo, h2_p, outputs, jnp.float32),
        "bo": _pad2(bo, 1, outputs, jnp.float32),
    }


# ------------------------- pure-JAX reference check --------------------------
def _reference(x, p):
    x = x.astype(jnp.float32)
    h = jnp.dot(x, p["w1"], preferred_element_type=jnp.float32)
    h = jnp.maximum(h + p["b1"], 0.0)
    h = jnp.dot(h, p["w2"], preferred_element_type=jnp.float32)
    h = jnp.maximum(h + p["b2"], 0.0)
    return jnp.dot(h, p["wo"], preferred_element_type=jnp.float32) + p["bo"]


if __name__ == "__main__":
    key = jax.random.PRNGKey(0)
    k_x, k_x2, k_p = jax.random.split(key, 3)

    # Small shapes consistent with the module (fc-only network)
    B, D_IN, H1, H2, OUT = 8, 16, 32, 32, 4

    x = jax.random.normal(k_x, (B, D_IN), jnp.float32)
    params = init_network_params(k_p, D_IN, H1, H2, OUT)

    # small-batch (single-step) path
    outs = network_forward(x, params)
    jax.block_until_ready(outs)
    ref = _reference(x, params)
    assert outs[0].shape == (B, OUT)
    assert jnp.allclose(outs[0], ref, atol=2e-2, rtol=2e-2)

    # large ragged-batch path: multi-step streamed grid with a partial last tile
    B2 = 2500
    x2 = jax.random.normal(k_x2, (B2, D_IN), jnp.float32)
    outs2 = network_forward(x2, params)
    jax.block_until_ready(outs2)
    ref2 = _reference(x2, params)
    assert outs2[0].shape == (B2, OUT)
    assert jnp.allclose(outs2[0], ref2, atol=2e-2, rtol=2e-2)

    print("KERNEL_OK")
</pallas_src>

<mosaic_0001>
module attributes {stable_mosaic.version = 11 : i64} {
  func.func @_mlp_kernel(%arg0: i32, %arg1: memref<8x16xf32, #tpu.memory_space<vmem>>, %arg2: memref<16x128xf32, #tpu.memory_space<vmem>>, %arg3: memref<1x128xf32, #tpu.memory_space<vmem>>, %arg4: memref<128x128xf32, #tpu.memory_space<vmem>>, %arg5: memref<1x128xf32, #tpu.memory_space<vmem>>, %arg6: memref<128x4xf32, #tpu.memory_space<vmem>>, %arg7: memref<1x4xf32, #tpu.memory_space<vmem>>, %arg8: memref<8x4xf32, #tpu.memory_space<vmem>>) attributes {dimension_semantics = [#tpu.dimension_semantics<parallel>], iteration_bounds = array<i64: 1>, scalar_prefetch = 0 : i64, scratch_operands = 0 : i64, tpu.core_type = #tpu.core_type<tc>, window_params = [{transform_indices = @transform_0, window_bounds = array<i64: 8, 16>}, {pipeline_mode = #tpu.pipeline_mode<synchronous>, transform_indices = @transform_1, window_bounds = array<i64: 16, 128>}, {pipeline_mode = #tpu.pipeline_mode<synchronous>, transform_indices = @transform_2, window_bounds = array<i64: 1, 128>}, {pipeline_mode = #tpu.pipeline_mode<synchronous>, transform_indices = @transform_3, window_bounds = array<i64: 128, 128>}, {pipeline_mode = #tpu.pipeline_mode<synchronous>, transform_indices = @transform_4, window_bounds = array<i64: 1, 128>}, {pipeline_mode = #tpu.pipeline_mode<synchronous>, transform_indices = @transform_5, window_bounds = array<i64: 128, 4>}, {pipeline_mode = #tpu.pipeline_mode<synchronous>, transform_indices = @transform_6, window_bounds = array<i64: 1, 4>}, {transform_indices = @transform_7, window_bounds = array<i64: 8, 4>}]} {
    %c0 = arith.constant 0 : index
    %c0_0 = arith.constant 0 : index
    %0 = vector.load %arg1[%c0, %c0_0] : memref<8x16xf32, #tpu.memory_space<vmem>>, vector<8x16xf32>
    %c0_1 = arith.constant 0 : index
    %c0_2 = arith.constant 0 : index
    %1 = vector.load %arg2[%c0_1, %c0_2] : memref<16x128xf32, #tpu.memory_space<vmem>>, vector<16x128xf32>
    %cst = arith.constant dense<0.000000e+00> : vector<8x128xf32>
    %2 = tpu.matmul %0, %1, %cst {dimension_numbers = #tpu.dot_dimension_numbers<[1], [0], [0], [1], [0, 0, 1, 1], [], []>} : vector<8x16xf32>, vector<16x128xf32>, vector<8x128xf32> -> vector<8x128xf32>
    %c0_3 = arith.constant 0 : index
    %c0_4 = arith.constant 0 : index
    %3 = vector.load %arg3[%c0_3, %c0_4] : memref<1x128xf32, #tpu.memory_space<vmem>>, vector<1x128xf32>
    %4 = vector.broadcast %3 : vector<1x128xf32> to vector<8x128xf32>
    %5 = arith.addf %2, %4 : vector<8x128xf32>
    %cst_5 = arith.constant 0.000000e+00 : f32
    %6 = vector.broadcast %cst_5 : f32 to vector<8x128xf32>
    %7 = arith.maximumf %5, %6 : vector<8x128xf32>
    %c0_6 = arith.constant 0 : index
    %c0_7 = arith.constant 0 : index
    %8 = vector.load %arg4[%c0_6, %c0_7] : memref<128x128xf32, #tpu.memory_space<vmem>>, vector<128x128xf32>
    %cst_8 = arith.constant dense<0.000000e+00> : vector<8x128xf32>
    %9 = tpu.matmul %7, %8, %cst_8 {dimension_numbers = #tpu.dot_dimension_numbers<[1], [0], [0], [1], [0, 0, 1, 1], [], []>} : vector<8x128xf32>, vector<128x128xf32>, vector<8x128xf32> -> vector<8x128xf32>
    %c0_9 = arith.constant 0 : index
    %c0_10 = arith.constant 0 : index
    %10 = vector.load %arg5[%c0_9, %c0_10] : memref<1x128xf32, #tpu.memory_space<vmem>>, vector<1x128xf32>
    %11 = vector.broadcast %10 : vector<1x128xf32> to vector<8x128xf32>
    %12 = arith.addf %9, %11 : vector<8x128xf32>
    %cst_11 = arith.constant 0.000000e+00 : f32
    %13 = vector.broadcast %cst_11 : f32 to vector<8x128xf32>
    %14 = arith.maximumf %12, %13 : vector<8x128xf32>
    %c0_12 = arith.constant 0 : index
    %c0_13 = arith.constant 0 : index
    %15 = vector.load %arg6[%c0_12, %c0_13] : memref<128x4xf32, #tpu.memory_space<vmem>>, vector<128x4xf32>
    %cst_14 = arith.constant dense<0.000000e+00> : vector<8x4xf32>
    %16 = tpu.matmul %14, %15, %cst_14 {dimension_numbers = #tpu.dot_dimension_numbers<[1], [0], [0], [1], [0, 0, 1, 1], [], []>} : vector<8x128xf32>, vector<128x4xf32>, vector<8x4xf32> -> vector<8x4xf32>
    %c0_15 = arith.constant 0 : index
    %c0_16 = arith.constant 0 : index
    %17 = vector.load %arg7[%c0_15, %c0_16] : memref<1x4xf32, #tpu.memory_space<vmem>>, vector<1x4xf32>
    %18 = vector.broadcast %17 : vector<1x4xf32> to vector<8x4xf32>
    %19 = arith.addf %16, %18 : vector<8x4xf32>
    %c0_17 = arith.constant 0 : index
    %c0_18 = arith.constant 0 : index
    %20 = vector.load %arg8[%c0_17, %c0_18] : memref<8x4xf32, #tpu.memory_space<vmem>>, vector<8x4xf32>
    tpu.vector_store %arg8[%c0_17, %c0_18], %19 {strides = array<i32>} : memref<8x4xf32, #tpu.memory_space<vmem>>, vector<8x4xf32>,
    return
  }
  func.func @transform_0(%arg0: i32) -> (i32, i32) {
    %c0_i32 = arith.constant 0 : i32
    %c0_i32_0 = arith.constant 0 : i32
    return %arg0, %c0_i32 : i32, i32
  }
  func.func @transform_1(%arg0: i32) -> (i32, i32) {
    %c0_i32 = arith.constant 0 : i32
    %c0_i32_0 = arith.constant 0 : i32
    %c0_i32_1 = arith.constant 0 : i32
    return %c0_i32, %c0_i32_0 : i32, i32
  }
  func.func @transform_2(%arg0: i32) -> (i32, i32) {
    %c0_i32 = arith.constant 0 : i32
    %c0_i32_0 = arith.constant 0 : i32
    %c0_i32_1 = arith.constant 0 : i32
    return %c0_i32, %c0_i32_0 : i32, i32
  }
  func.func @transform_3(%arg0: i32) -> (i32, i32) {
    %c0_i32 = arith.constant 0 : i32
    %c0_i32_0 = arith.constant 0 : i32
    %c0_i32_1 = arith.constant 0 : i32
    return %c0_i32, %c0_i32_0 : i32, i32
  }
  func.func @transform_4(%arg0: i32) -> (i32, i32) {
    %c0_i32 = arith.constant 0 : i32
    %c0_i32_0 = arith.constant 0 : i32
    %c0_i32_1 = arith.constant 0 : i32
    return %c0_i32, %c0_i32_0 : i32, i32
  }
  func.func @transform_5(%arg0: i32) -> (i32, i32) {
    %c0_i32 = arith.constant 0 : i32
    %c0_i32_0 = arith.constant 0 : i32
    %c0_i32_1 = arith.constant 0 : i32
    return %c0_i32, %c0_i32_0 : i32, i32
  }
  func.func @transform_6(%arg0: i32) -> (i32, i32) {
    %c0_i32 = arith.constant 0 : i32
    %c0_i32_0 = arith.constant 0 : i32
    %c0_i32_1 = arith.constant 0 : i32
    return %c0_i32, %c0_i32_0 : i32, i32
  }
  func.func @transform_7(%arg0: i32) -> (i32, i32) {
    %c0_i32 = arith.constant 0 : i32
    %c0_i32_0 = arith.constant 0 : i32
    return %arg0, %c0_i32 : i32, i32
  }
}

</mosaic_0001>

<bundles_post_ra>
// kernel: tpu_custom_call.1
= control target key start
LH: loop header
LB: loop body
LE: loop exit
PB: predicated region body
PF: predicated region fallthrough
CT: control target
= control target key end

     0   :  { %12 = vsyncpa [#allocation3], 0  ;;  %s518_s24 = smov [#allocation2]   ;;  %s707_s0 = inlined_call_operand.vmem [shape: f32[8,16], index: 0, kind: input, shape index: {}]   ;;  %s708_s1 = inlined_call_operand.hbm [shape: f32[16,128], index: 1, kind: input, shape index: {}]   ;;  %s709_s2 = inlined_call_operand.vmem [shape: f32[1,128], index: 2, kind: input, shape index: {}]   ;;  %s710_s3 = inlined_call_operand.vmem [shape: f32[128,128], index: 3, kind: input, shape index: {}]   ;;  %s711_s4 = inlined_call_operand.vmem [shape: f32[1,128], index: 4, kind: input, shape index: {}]   ;;  %s712_s5 = inlined_call_operand.vmem [shape: f32[128,4], index: 5, kind: input, shape index: {}]   ;;  %s713_s6 = inlined_call_operand.vmem [shape: f32[1,4], index: 6, kind: input, shape index: {}]   ;;  %s714_s7 = inlined_call_operand.vmem [shape: f32[8,4], index: 7, kind: output, shape index: {}]  }
   0x1   :  { %s20_s25 = sshll.u32 %s518_s24, 4  ;;  %s494_s28 = scalar_lea.hbm %s708_s1, 256  ;;  %s21_s25 = int_to_ptr.vmem [resolvable:$true] %s20_s25 }
   0x2   :  { %p495_p0 = scmp.ne.s32.totalorder %s708_s1, %s494_s28  ;;  %p498_p1 = scmp.lt.u32.totalorder %s494_s28, %s708_s1 }
   0x4   :  { %p500_p2 = pnand %p498_p1, %p495_p0 }
   0x6   :  { %503 = shalt.err (!%p500_p2)
}
   0x7   :  { %s504_s10 = scalar_lea.vmem %s21_s25, 256  ;;  %p509_p4 = scmp.lt.s32.totalorder %s21_s25, %s21_s25 }
   0x8   :  { %p505_p3 = scmp.ne.s32.totalorder %s21_s25, %s504_s10  ;;  %p510_p5 = scmp.lt.s32.totalorder %s504_s10, %s504_s10 }
   0xa   :  { %p511_p6 = por %p510_p5, %p509_p4 }
   0xc   :  { %p512_p7 = pnand %p511_p6, %p505_p3 }
   0xe   :  { %515 = shalt.err (!%p512_p7)
}
   0xf   :  { %s519_s11 = smov 128   ;;  %s520_s12 = smov 8  }
  0x10   :  { %26 = dma.hbm_to_vmem [thread:$0]  %s708_s1, 256, %s21_s25, [#allocation3], %s519_s11, %s519_s11, %s520_s12  }
  0x11   :  { %516 = dma.done.wait [#allocation3], 256  }
  0x12   :  { %517 = vsyncadd [#allocation3], 4294967040  ;;  %v521_v0 = vmov 0.0|0.0   ;;  %vm522_vm0 = vmmov 0   ;;  %v523_v1 = vmov 0.0   ;;  %v41_v2 = vld [vmem:[#allocation2] sm:$0xff] }
  0x13   :  { %437 = vmatprep.subr.bf16.mxu0 %v521_v0  ;;  %364 = vmatprep.mubr.msk.f32.mxu0 %vm522_vm0, %v523_v1  ;;  %v42_v3 = vld [vmem:[#allocation2 + $0x8] sm:$0xff]  ;;  %v125_v5 = vld [vmem:[%s710_s3] sm:$0xff]  ;;  %v127_v7 = vld [vmem:[%s710_s3 + $0x10] sm:$0xff]  ;;  %vm50_vm1 = vcmask 130048   ;;  %vm312_vm2 = vcmask 31744  }
  0x14   :  { %440 = vmatprep.subr.bf16.mxu1 %v521_v0  ;;  %399 = vmatprep.mubr.msk.f32.mxu1 %vm522_vm0, %v523_v1  ;;  %v438_v4 = vpack.c.bf16 %v42_v3, %v41_v2  ;;  %v126_v6 = vld [vmem:[%s710_s3 + $0x8] sm:$0xff]  ;;  %v128_v9 = vld [vmem:[%s710_s3 + $0x18] sm:$0xff]  ;;  %v40_v10 = vld [vmem:[%s707_s0] sm:$0xff] }
  0x15   :  { %v441_v8 = vpack.c.bf16 %v126_v6, %v125_v5  ;;  %v444_v11 = vpack.c.bf16 %v128_v9, %v127_v7  ;;  %v129_v12 = vld [vmem:[%s710_s3 + $0x20] sm:$0xff]  ;;  %v130_v13 = vld [vmem:[%s710_s3 + $0x28] sm:$0xff]  ;;  %v131_v15 = vld [vmem:[%s710_s3 + $0x30] sm:$0xff] }
  0x16   :  { %439 = vmatpush3.bf16.msra.mxu0 %v438_v4  ;;  %v447_v14 = vpack.c.bf16 %v130_v13, %v129_v12  ;;  %v132_v16 = vld [vmem:[%s710_s3 + $0x38] sm:$0xff]  ;;  %v133_v18 = vld [vmem:[%s710_s3 + $0x40] sm:$0xff]  ;;  %v134_v19 = vld [vmem:[%s710_s3 + $0x48] sm:$0xff] }
  0x17   :  { %442 = vmatpush3.bf16.msra.mxu1 %v441_v8  ;;  %464 = vmatprep.subr.bf16.mxu0 %v521_v0  ;;  %v450_v17 = vpack.c.bf16 %v132_v16, %v131_v15  ;;  %v453_v20 = vpack.c.bf16 %v134_v19, %v133_v18  ;;  %v135_v21 = vld [vmem:[%s710_s3 + $0x50] sm:$0xff]  ;;  %v136_v22 = vld [vmem:[%s710_s3 + $0x58] sm:$0xff]  ;;  %v137_v24 = vld [vmem:[%s710_s3 + $0x60] sm:$0xff] }
  0x18   :  { %443 = vmatprep.subr.bf16.mxu1 %v521_v0  ;;  %v456_v23 = vpack.c.bf16 %v136_v22, %v135_v21  ;;  %v138_v25 = vld [vmem:[%s710_s3 + $0x68] sm:$0xff]  ;;  %v139_v27 = vld [vmem:[%s710_s3 + $0x70] sm:$0xff]  ;;  %v140_v28 = vld [vmem:[%s710_s3 + $0x78] sm:$0xff] }
  0x19   :  { %365 = vmatmul.mubr.msk.f32.vlgmr.msra.gmra.mrb[0].mxu0 %vm50_vm1, %v40_v10  ;;  %v459_v26 = vpack.c.bf16 %v138_v25, %v137_v24  ;;  %v462_v29 = vpack.c.bf16 %v140_v28, %v139_v27  ;;  %v219_v30 = vld [vmem:[%s712_s5] sm:$0xff]  ;;  %v220_v31 = vld [vmem:[%s712_s5 + $0x8] sm:$0xff]  ;;  %v221_v32 = vld [vmem:[%s712_s5 + $0x10] sm:$0xff] }
  0x1a   :  { %434 = vmatprep.mubr.msk.f32.mxu0 %vm522_vm0, %v523_v1  ;;  %v465_v33 = vpack.c.bf16 %v220_v31, %v219_v30  ;;  %v222_v34 = vld [vmem:[%s712_s5 + $0x18] sm:$0xff]  ;;  %v223_v36 = vld [vmem:[%s712_s5 + $0x20] sm:$0xff]  ;;  %v224_v37 = vld [vmem:[%s712_s5 + $0x28] sm:$0xff] }
  0x1b   :  { %445 = vmatpush3.bf16.msra.mxu1 %v444_v11  ;;  %v468_v35 = vpack.c.bf16 %v222_v34, %v221_v32  ;;  %v471_v38 = vpack.c.bf16 %v224_v37, %v223_v36  ;;  %v225_v39 = vld [vmem:[%s712_s5 + $0x30] sm:$0xff]  ;;  %v226_v40 = vld [vmem:[%s712_s5 + $0x38] sm:$0xff]  ;;  %v227_v42 = vld [vmem:[%s712_s5 + $0x40] sm:$0xff] }
  0x1c   :  { %446 = vmatprep.subr.bf16.mxu1 %v521_v0  ;;  %466 = vmatpush3.bf16.msra.mxu0 %v465_v33  ;;  %v474_v41 = vpack.c.bf16 %v226_v40, %v225_v39  ;;  %v228_v43 = vld [vmem:[%s712_s5 + $0x48] sm:$0xff]  ;;  %v229_v45 = vld [vmem:[%s712_s5 + $0x50] sm:$0xff]  ;;  %v230_v46 = vld [vmem:[%s712_s5 + $0x58] sm:$0xff] }
  0x1d   :  { %467 = vmatprep.subr.bf16.mxu0 %v521_v0  ;;  %v477_v44 = vpack.c.bf16 %v228_v43, %v227_v42  ;;  %v480_v47 = vpack.c.bf16 %v230_v46, %v229_v45  ;;  %v231_v48 = vld [vmem:[%s712_s5 + $0x60] sm:$0xff]  ;;  %v232_v49 = vld [vmem:[%s712_s5 + $0x68] sm:$0xff]  ;;  %v233_v56 = vld [vmem:[%s712_s5 + $0x70] sm:$0xff] }
  0x1e   :  { %v483_v50 = vpack.c.bf16 %v232_v49, %v231_v48  ;;  %v319_v51 = vld [vmem:[%s709_s2] ss:$0 sm:$0xff]  ;;  %v234_v57 = vld [vmem:[%s712_s5 + $0x78] sm:$0xff] }
  0x1f   :  { %448 = vmatpush3.bf16.msra.mxu1 %v447_v14  ;;  %v486_v58 = vpack.c.bf16 %v234_v57, %v233_v56  ;;  %v321_v59 = vld [vmem:[%s711_s4] ss:$0 sm:$0xff] }
  0x20   :  { %449 = vmatprep.subr.bf16.mxu1 %v521_v0  ;;  %469 = vmatpush3.bf16.msra.mxu0 %v468_v35 }
  0x21   :  { %470 = vmatprep.subr.bf16.mxu0 %v521_v0 }
  0x23   :  { %451 = vmatpush3.bf16.msra.mxu1 %v450_v17 }
  0x24   :  { %452 = vmatprep.subr.bf16.mxu1 %v521_v0  ;;  %472 = vmatpush3.bf16.msra.mxu0 %v471_v38 }
  0x25   :  { %473 = vmatprep.subr.bf16.mxu0 %v521_v0 }
  0x27   :  { %454 = vmatpush3.bf16.msra.mxu1 %v453_v20 }
  0x28   :  { %455 = vmatprep.subr.bf16.mxu1 %v521_v0  ;;  %475 = vmatpush3.bf16.msra.mxu0 %v474_v41 }
  0x29   :  { %476 = vmatprep.subr.bf16.mxu0 %v521_v0 }
  0x2b   :  { %457 = vmatpush3.bf16.msra.mxu1 %v456_v23 }
  0x2c   :  { %458 = vmatprep.subr.bf16.mxu1 %v521_v0  ;;  %478 = vmatpush3.bf16.msra.mxu0 %v477_v44 }
  0x2d   :  { %479 = vmatprep.subr.bf16.mxu0 %v521_v0 }
  0x2f   :  { %460 = vmatpush3.bf16.msra.mxu1 %v459_v26 }
  0x30   :  { %461 = vmatprep.subr.bf16.mxu1 %v521_v0  ;;  %481 = vmatpush3.bf16.msra.mxu0 %v480_v47 }
  0x31   :  { %482 = vmatprep.subr.bf16.mxu0 %v521_v0 }
  0x33   :  { %463 = vmatpush3.bf16.msra.mxu1 %v462_v29 }
  0x34   :  { %484 = vmatpush3.bf16.msra.mxu0 %v483_v50 }
  0x35   :  { %485 = vmatprep.subr.bf16.mxu0 %v521_v0  ;;  %v322_v0 = vld [vmem:[%s713_s6] ss:$0 sm:$0xff] }
  0x38   :  { %487 = vmatpush3.bf16.msra.mxu0 %v486_v58 }
  0xec   :  { %v120_v52 = vpop.f32.mrb[0].mxu0 }
  0xed   :  { %v121_v53 = vadd.f32 %v319_v51, %v120_v52  ;;  %v366_v54 = vpop.f32.mrb[1].mxu0 }
  0xef   :  { %v124_v55 = vmax.f32 %v121_v53, 0.0 }
  0xf1   :  { %400 = vmatmul.mubr.f32.vlgmr.msra.gmra.mrb[0].mxu1 %v124_v55 }
 0x1c4   :  { %v214_v60 = vpop.f32.mrb[0].mxu1 }
 0x1c5   :  { %v215_v61 = vadd.f32 %v321_v59, %v214_v60  ;;  %v401_v62 = vpop.f32.mrb[1].mxu1 }
 0x1c7   :  { %v218_v63 = vmax.f32 %v215_v61, 0.0 }
 0x1c9   :  { %435 = vmatmul.mubr.f32.vlgmr.msra.gmra.mrb[2].mxu0 %v218_v63 }
 0x29c   :  { %v308_v1 = vpop.f32.mrb[2].mxu0 }
 0x29d   :  { %v309_v2 = vadd.f32 %v322_v0, %v308_v1  ;;  %v436_v3 = vpop.f32.mrb[3].mxu0 }
 0x29f   :  { %313 = vst.msk [vmem:[%s714_s7] sm:$0xff] %vm312_vm2, %v309_v2 }
 0x2a0   :  { %318 = vsyncpa [#allocation3], 1 }

</bundles_post_ra>
